<compile_context>
chip_gen: v7x
topology: tpu7x:2x2x1
jax: 0.10.0
libtpu: 0.0.40
codegen_flags: <defaults>
</compile_context>

<pallas_src>
import functools

import jax
import jax.numpy as jnp
from jax.experimental import pallas as pl
from jax.experimental.pallas import tpu as pltpu

_HID_PAD = 128
_DOUT_PAD = 128


def _round_up(a, b):
    return (a + b - 1) // b * b


def _smooth_l1(pred, tgt):
    # torch.nn.SmoothL1Loss(reduction='none'), beta = 1.0
    d = pred - tgt
    ad = jnp.abs(d)
    return jnp.where(ad < 1.0, 0.5 * d * d, ad - 0.5)


# ----------------------------------------------------------------------------
# Fused kernel: model head (2 MXU dots) + get_loss (IoU soft-label, soft CE,
# masked SmoothL1) with cross-tile accumulation in SMEM scratch.
# ----------------------------------------------------------------------------
def _fused_kernel(x_ref, pb_ref, reg_ref, cls_ref,
                  w1p_ref, w1b_ref, b1_ref, w2_ref, b2_ref,
                  out_ref, acc_ref,
                  *, num_classes, loss_weight, true_n):
    i = pl.program_id(0)

    @pl.when(i == 0)
    def _():
        for j in range(8):
            acc_ref[j] = jnp.float32(0.0)

    # ---- model head: out = relu(x@W1p + pb@W1b + b1) @ W2 + b2 -------------
    # bf16 MXU inputs with f32 accumulation (v6e/v7x MXU peak is bf16).
    pb = pb_ref[...]                                               # (T, 7) f32
    h = (jnp.dot(x_ref[...].astype(jnp.bfloat16), w1p_ref[...],
                 preferred_element_type=jnp.float32)
         + jnp.dot(pb, w1b_ref[...], preferred_element_type=jnp.float32)
         + b1_ref[...])
    h = jnp.maximum(h, 0.0)
    out = (jnp.dot(h.astype(jnp.bfloat16), w2_ref[...],
                   preferred_element_type=jnp.float32)
           + b2_ref[...])                                          # (T, 128)

    nc = num_classes
    logits = out[:, :nc]
    centers = out[:, nc:nc + 3]
    sizes = out[:, nc + 3:nc + 6]
    headings = out[:, nc + 6:nc + 7]

    reg = reg_ref[...]                                             # (T, 7)
    cls = cls_ref[...]                                             # (T, 1) int32
    anchor = pb[:, 3:6]                                            # (T, 3)

    gt_c = reg[:, 0:3]
    gt_d = reg[:, 3:6]
    gt_theta = reg[:, 6:7]

    # ---- parse_labels -------------------------------------------------------
    center_labels = gt_c / anchor
    residual_size_labels = jnp.log(gt_d / anchor)

    # ---- from_prediction_to_label_format ------------------------------------
    sizes_pred = jnp.exp(sizes) * anchor
    centers_pred = centers * anchor

    # ---- IoU on whole (T, 3) tiles ------------------------------------------
    # TODO(synk): boxes_iou3d_gpu is a rotated-BEV CUDA op; approximated here
    # with axis-aligned 3D IoU (heading ignored).
    lo = jnp.maximum(gt_c - 0.5 * gt_d, centers_pred - 0.5 * sizes_pred)
    hi = jnp.minimum(gt_c + 0.5 * gt_d, centers_pred + 0.5 * sizes_pred)
    ov = jnp.maximum(hi - lo, 0.0)                                 # (T, 3)
    inter = ov[:, 0:1] * ov[:, 1:2] * ov[:, 2:3]
    vol_a = gt_d[:, 0:1] * gt_d[:, 1:2] * gt_d[:, 2:3]
    vol_b = sizes_pred[:, 0:1] * sizes_pred[:, 1:2] * sizes_pred[:, 2:3]
    union = jnp.maximum(vol_a + vol_b - inter, 1e-7)
    iou = inter * pl.reciprocal(union, approx=True)
    ious = jnp.clip(2.0 * iou - 0.5, 0.0, 1.0)                     # (T, 1)

    # ---- soft cross-entropy with IoU-weighted one-hot labels ----------------
    onehot = (jax.lax.broadcasted_iota(jnp.int32, logits.shape, 1) == cls
              ).astype(jnp.float32)                                # (T, nc)
    iou_label = onehot * ious

    m = jnp.max(logits, axis=1, keepdims=True)
    z = logits - m
    logp = z - jnp.log(jnp.sum(jnp.exp(z), axis=1, keepdims=True))
    cls_sum = -jnp.sum(iou_label * logp)

    # ---- masked SmoothL1 partial sums ---------------------------------------
    mask = (cls > 0).astype(jnp.float32)                           # (T, 1)
    center_sum = jnp.sum(_smooth_l1(centers, center_labels) * mask) * (1.0 / 3.0)
    size_sum = jnp.sum(_smooth_l1(sizes, residual_size_labels) * mask) * (1.0 / 3.0)
    heading_sum = jnp.sum(_smooth_l1(headings, gt_theta) * mask)
    mask_sum = jnp.sum(mask)

    acc_ref[0] += cls_sum
    acc_ref[1] += center_sum
    acc_ref[2] += size_sum
    acc_ref[3] += heading_sum
    acc_ref[4] += mask_sum

    @pl.when(i == pl.num_programs(0) - 1)
    def _():
        cls_loss = acc_ref[0] * (1.0 / true_n)        # torch .mean() over true N
        inv_d = 1.0 / (acc_ref[4] + 1e-5)
        center_loss = acc_ref[1] * inv_d
        size_loss = acc_ref[2] * inv_d
        heading_loss = acc_ref[3] * inv_d
        loss = cls_loss + loss_weight * (center_loss + size_loss + heading_loss)
        out_ref[0] = loss
        out_ref[1] = cls_loss
        out_ref[2] = center_loss
        out_ref[3] = size_loss
        out_ref[4] = heading_loss
        out_ref[5] = acc_ref[4]
        out_ref[6] = jnp.float32(0.0)
        out_ref[7] = jnp.float32(0.0)


# ----------------------------------------------------------------------------
# FullModel.forward wrapper (single pallas_call)
# ----------------------------------------------------------------------------
def full_model_forward(params, inputs, pred_bbox, cls_labels, reg_labels,
                       *, num_classes, loss_weight):
    n, c, p = inputs.shape
    d_pts = c * p
    x_pts = inputs.reshape(n, d_pts).astype(jnp.float32)
    pb = pred_bbox.astype(jnp.float32)
    reg = reg_labels.astype(jnp.float32)
    cls2d = cls_labels.astype(jnp.int32).reshape(n, 1)

    # --- row tiling; pad with inert rows (cls=-1, unit dims -> zero loss) ----
    tile_n = 256 if n >= 256 else _round_up(n, 16)
    n_pad = _round_up(n, tile_n)
    if n_pad != n:
        pad = n_pad - n
        safe_box = jnp.broadcast_to(
            jnp.array([0., 0., 0., 1., 1., 1., 0.], jnp.float32), (pad, 7))
        x_pts = jnp.concatenate(
            [x_pts, jnp.zeros((pad, d_pts), jnp.float32)], axis=0)
        pb = jnp.concatenate([pb, safe_box], axis=0)
        reg = jnp.concatenate([reg, safe_box], axis=0)
        cls2d = jnp.concatenate(
            [cls2d, jnp.full((pad, 1), -1, jnp.int32)], axis=0)

    # --- pad weights to MXU/lane-friendly shapes, bf16 for the big dots ------
    w1, b1, w2, b2 = params["w1"], params["b1"], params["w2"], params["b2"]
    hid = w1.shape[1]
    d_out = w2.shape[1]
    w1_pts = jnp.pad(w1[:d_pts], ((0, 0), (0, _HID_PAD - hid))).astype(jnp.bfloat16)
    w1_pb = jnp.pad(w1[d_pts:], ((0, 0), (0, _HID_PAD - hid)))      # f32, tiny K=7 dot
    b1_p = jnp.pad(b1, ((0, 0), (0, _HID_PAD - hid)))
    w2_p = jnp.pad(w2, ((0, _HID_PAD - hid), (0, _DOUT_PAD - d_out))).astype(jnp.bfloat16)
    b2_p = jnp.pad(b2, ((0, 0), (0, _DOUT_PAD - d_out)))

    kernel = functools.partial(
        _fused_kernel, num_classes=num_classes,
        loss_weight=float(loss_weight), true_n=float(n))

    row = lambda i: (i, 0)     # per-batch-tile blocks
    const = lambda i: (0, 0)   # weights/biases stay resident across the grid

    res = pl.pallas_call(
        kernel,
        out_shape=jax.ShapeDtypeStruct((8,), jnp.float32),
        grid_spec=pltpu.PrefetchScalarGridSpec(
            num_scalar_prefetch=0,
            grid=(n_pad // tile_n,),
            in_specs=[
                pl.BlockSpec((tile_n, d_pts), row),          # point features
                pl.BlockSpec((tile_n, 7), row),              # pred_bbox
                pl.BlockSpec((tile_n, 7), row),              # reg_labels
                pl.BlockSpec((tile_n, 1), row),              # cls_labels
                pl.BlockSpec((d_pts, _HID_PAD), const),      # W1 (points part)
                pl.BlockSpec((7, _HID_PAD), const),          # W1 (bbox part)
                pl.BlockSpec((1, _HID_PAD), const),          # b1
                pl.BlockSpec((_HID_PAD, _DOUT_PAD), const),  # W2
                pl.BlockSpec((1, _DOUT_PAD), const),         # b2
            ],
            out_specs=pl.BlockSpec(
                (8,), lambda i: (0,), memory_space=pltpu.MemorySpace.SMEM),
            scratch_shapes=[pltpu.SMEM((8,), jnp.float32)],
        ),
        compiler_params=pltpu.CompilerParams(
            # batch axis carries the loss accumulator -> must stay sequential
            dimension_semantics=("arbitrary",),
        ),
    )(x_pts, pb, reg, cls2d, w1_pts, w1_pb, b1_p, w2_p, b2_p)

    # (loss, cls_loss, center_loss, size_loss, heading_loss, valid_box_num)
    return res[0], res[1], res[2], res[3], res[4], res[5]


# ----------------------------------------------------------------------------
# main
# ----------------------------------------------------------------------------
if __name__ == "__main__":
    key = jax.random.PRNGKey(0)
    N, C_IN, P = 8, 4, 16          # batch of 8 proposals, 4 channels, 16 points
    NUM_CLASSES = 4
    LOSS_WEIGHT = 2.0              # cfg.TRAIN.LOSS_WEIGHT

    k = jax.random.split(key, 8)
    inputs = jax.random.normal(k[0], (N, C_IN, P), jnp.float32)

    # boxes: [x, y, z, l, w, h, heading]  (dims strictly positive)
    pb_center = jax.random.uniform(k[1], (N, 3), jnp.float32, -1.0, 1.0)
    pb_dims = jax.random.uniform(k[2], (N, 3), jnp.float32, 1.0, 3.0)
    pb_head = jax.random.uniform(k[3], (N, 1), jnp.float32, -3.14, 3.14)
    pred_bbox = jnp.concatenate([pb_center, pb_dims, pb_head], axis=1)

    rl_center = pb_center + jax.random.uniform(k[4], (N, 3), jnp.float32, -0.3, 0.3)
    rl_dims = pb_dims * jax.random.uniform(k[5], (N, 3), jnp.float32, 0.8, 1.25)
    rl_head = pb_head + jax.random.uniform(k[6], (N, 1), jnp.float32, -0.2, 0.2)
    reg_labels = jnp.concatenate([rl_center, rl_dims, rl_head], axis=1)

    cls_labels = jnp.array([0, 1, 2, 3, 1, 0, 2, 1], dtype=jnp.int32)

    # deterministic synthetic model parameters (inner `self.model` head)
    D_IN = C_IN * P + 7
    HID = 32
    D_OUT = NUM_CLASSES + 3 + 3 + 1
    kw = jax.random.split(k[7], 4)
    params = {
        "w1": 0.1 * jax.random.normal(kw[0], (D_IN, HID), jnp.float32),
        "b1": 0.1 * jax.random.normal(kw[1], (1, HID), jnp.float32),
        "w2": 0.1 * jax.random.normal(kw[2], (HID, D_OUT), jnp.float32),
        "b2": 0.1 * jax.random.normal(kw[3], (1, D_OUT), jnp.float32),
    }

    fwd = jax.jit(
        functools.partial(
            full_model_forward, num_classes=NUM_CLASSES, loss_weight=LOSS_WEIGHT
        )
    )
    loss, cls_loss, center_loss, size_loss, heading_loss, valid_box_num = fwd(
        params, inputs, pred_bbox, cls_labels, reg_labels
    )
    jax.block_until_ready(
        (loss, cls_loss, center_loss, size_loss, heading_loss, valid_box_num)
    )
    print("KERNEL_OK")
</pallas_src>

<mosaic_0001>
module attributes {stable_mosaic.version = 11 : i64} {
  func.func @_fused_kernel(%arg0: i32, %arg1: memref<16x64xf32, #tpu.memory_space<vmem>>, %arg2: memref<16x7xf32, #tpu.memory_space<vmem>>, %arg3: memref<16x7xf32, #tpu.memory_space<vmem>>, %arg4: memref<16x1xi32, #tpu.memory_space<vmem>>, %arg5: memref<64x128xbf16, #tpu.memory_space<vmem>>, %arg6: memref<7x128xf32, #tpu.memory_space<vmem>>, %arg7: memref<1x128xf32, #tpu.memory_space<vmem>>, %arg8: memref<128x128xbf16, #tpu.memory_space<vmem>>, %arg9: memref<1x128xf32, #tpu.memory_space<vmem>>, %arg10: memref<8xf32, #tpu.memory_space<smem>>, %arg11: memref<8xf32, #tpu.memory_space<smem>>) attributes {dimension_semantics = [#tpu.dimension_semantics<arbitrary>], iteration_bounds = array<i64: 1>, scalar_prefetch = 0 : i64, scratch_operands = 1 : i64, tpu.core_type = #tpu.core_type<tc>, window_params = [{transform_indices = @transform_0, window_bounds = array<i64: 16, 64>}, {transform_indices = @transform_1, window_bounds = array<i64: 16, 7>}, {transform_indices = @transform_2, window_bounds = array<i64: 16, 7>}, {transform_indices = @transform_3, window_bounds = array<i64: 16, 1>}, {pipeline_mode = #tpu.pipeline_mode<synchronous>, transform_indices = @transform_4, window_bounds = array<i64: 64, 128>}, {pipeline_mode = #tpu.pipeline_mode<synchronous>, transform_indices = @transform_5, window_bounds = array<i64: 7, 128>}, {pipeline_mode = #tpu.pipeline_mode<synchronous>, transform_indices = @transform_6, window_bounds = array<i64: 1, 128>}, {pipeline_mode = #tpu.pipeline_mode<synchronous>, transform_indices = @transform_7, window_bounds = array<i64: 128, 128>}, {pipeline_mode = #tpu.pipeline_mode<synchronous>, transform_indices = @transform_8, window_bounds = array<i64: 1, 128>}, {transform_indices = @transform_9, window_bounds = array<i64: 8>}]} {
    %c0_i32 = arith.constant 0 : i32
    %0 = arith.cmpi eq, %arg0, %c0_i32 : i32
    %1 = arith.extui %0 : i1 to i32
    %c0_i32_0 = arith.constant 0 : i32
    %2 = arith.cmpi ne, %1, %c0_i32_0 : i32
    scf.if %2 {
      %cst_59 = arith.constant 0.000000e+00 : f32
      %c0_60 = arith.constant 0 : index
      %182 = memref.load %arg11[%c0_60] : memref<8xf32, #tpu.memory_space<smem>>
      memref.store %cst_59, %arg11[%c0_60] : memref<8xf32, #tpu.memory_space<smem>>
      %cst_61 = arith.constant 0.000000e+00 : f32
      %c1_62 = arith.constant 1 : index
      %183 = memref.load %arg11[%c1_62] : memref<8xf32, #tpu.memory_space<smem>>
      memref.store %cst_61, %arg11[%c1_62] : memref<8xf32, #tpu.memory_space<smem>>
      %cst_63 = arith.constant 0.000000e+00 : f32
      %c2_64 = arith.constant 2 : index
      %184 = memref.load %arg11[%c2_64] : memref<8xf32, #tpu.memory_space<smem>>
      memref.store %cst_63, %arg11[%c2_64] : memref<8xf32, #tpu.memory_space<smem>>
      %cst_65 = arith.constant 0.000000e+00 : f32
      %c3_66 = arith.constant 3 : index
      %185 = memref.load %arg11[%c3_66] : memref<8xf32, #tpu.memory_space<smem>>
      memref.store %cst_65, %arg11[%c3_66] : memref<8xf32, #tpu.memory_space<smem>>
      %cst_67 = arith.constant 0.000000e+00 : f32
      %c4_68 = arith.constant 4 : index
      %186 = memref.load %arg11[%c4_68] : memref<8xf32, #tpu.memory_space<smem>>
      memref.store %cst_67, %arg11[%c4_68] : memref<8xf32, #tpu.memory_space<smem>>
      %cst_69 = arith.constant 0.000000e+00 : f32
      %c5 = arith.constant 5 : index
      %187 = memref.load %arg11[%c5] : memref<8xf32, #tpu.memory_space<smem>>
      memref.store %cst_69, %arg11[%c5] : memref<8xf32, #tpu.memory_space<smem>>
      %cst_70 = arith.constant 0.000000e+00 : f32
      %c6 = arith.constant 6 : index
      %188 = memref.load %arg11[%c6] : memref<8xf32, #tpu.memory_space<smem>>
      memref.store %cst_70, %arg11[%c6] : memref<8xf32, #tpu.memory_space<smem>>
      %cst_71 = arith.constant 0.000000e+00 : f32
      %c7 = arith.constant 7 : index
      %189 = memref.load %arg11[%c7] : memref<8xf32, #tpu.memory_space<smem>>
      memref.store %cst_71, %arg11[%c7] : memref<8xf32, #tpu.memory_space<smem>>
    } else {
    }
    %c0 = arith.constant 0 : index
    %c0_1 = arith.constant 0 : index
    %3 = vector.load %arg2[%c0, %c0_1] : memref<16x7xf32, #tpu.memory_space<vmem>>, vector<16x7xf32>
    %c0_2 = arith.constant 0 : index
    %c0_3 = arith.constant 0 : index
    %4 = vector.load %arg1[%c0_2, %c0_3] : memref<16x64xf32, #tpu.memory_space<vmem>>, vector<16x64xf32>
    %5 = arith.truncf %4 : vector<16x64xf32> to vector<16x64xbf16>
    %c0_4 = arith.constant 0 : index
    %c0_5 = arith.constant 0 : index
    %6 = vector.load %arg5[%c0_4, %c0_5] : memref<64x128xbf16, #tpu.memory_space<vmem>>, vector<64x128xbf16>
    %cst = arith.constant dense<0.000000e+00> : vector<16x128xf32>
    %7 = tpu.matmul %5, %6, %cst {dimension_numbers = #tpu.dot_dimension_numbers<[1], [0], [0], [1], [0, 0, 1, 1], [], []>} : vector<16x64xbf16>, vector<64x128xbf16>, vector<16x128xf32> -> vector<16x128xf32>
    %c0_6 = arith.constant 0 : index
    %c0_7 = arith.constant 0 : index
    %8 = vector.load %arg6[%c0_6, %c0_7] : memref<7x128xf32, #tpu.memory_space<vmem>>, vector<7x128xf32>
    %cst_8 = arith.constant dense<0.000000e+00> : vector<16x128xf32>
    %9 = tpu.matmul %3, %8, %cst_8 {dimension_numbers = #tpu.dot_dimension_numbers<[1], [0], [0], [1], [0, 0, 1, 1], [], []>} : vector<16x7xf32>, vector<7x128xf32>, vector<16x128xf32> -> vector<16x128xf32>
    %10 = arith.addf %7, %9 : vector<16x128xf32>
    %c0_9 = arith.constant 0 : index
    %c0_10 = arith.constant 0 : index
    %11 = vector.load %arg7[%c0_9, %c0_10] : memref<1x128xf32, #tpu.memory_space<vmem>>, vector<1x128xf32>
    %12 = vector.broadcast %11 : vector<1x128xf32> to vector<16x128xf32>
    %13 = arith.addf %10, %12 : vector<16x128xf32>
    %cst_11 = arith.constant 0.000000e+00 : f32
    %14 = vector.broadcast %cst_11 : f32 to vector<16x128xf32>
    %15 = arith.maximumf %13, %14 : vector<16x128xf32>
    %16 = arith.truncf %15 : vector<16x128xf32> to vector<16x128xbf16>
    %c0_12 = arith.constant 0 : index
    %c0_13 = arith.constant 0 : index
    %17 = vector.load %arg8[%c0_12, %c0_13] : memref<128x128xbf16, #tpu.memory_space<vmem>>, vector<128x128xbf16>
    %cst_14 = arith.constant dense<0.000000e+00> : vector<16x128xf32>
    %18 = tpu.matmul %16, %17, %cst_14 {dimension_numbers = #tpu.dot_dimension_numbers<[1], [0], [0], [1], [0, 0, 1, 1], [], []>} : vector<16x128xbf16>, vector<128x128xbf16>, vector<16x128xf32> -> vector<16x128xf32>
    %c0_15 = arith.constant 0 : index
    %c0_16 = arith.constant 0 : index
    %19 = vector.load %arg9[%c0_15, %c0_16] : memref<1x128xf32, #tpu.memory_space<vmem>>, vector<1x128xf32>
    %20 = vector.broadcast %19 : vector<1x128xf32> to vector<16x128xf32>
    %21 = arith.addf %18, %20 : vector<16x128xf32>
    %22 = vector.extract_strided_slice %21 {offsets = [0, 0], sizes = [16, 4], strides = [1, 1]} : vector<16x128xf32> to vector<16x4xf32>
    %23 = vector.extract_strided_slice %21 {offsets = [0, 4], sizes = [16, 3], strides = [1, 1]} : vector<16x128xf32> to vector<16x3xf32>
    %24 = vector.extract_strided_slice %21 {offsets = [0, 7], sizes = [16, 3], strides = [1, 1]} : vector<16x128xf32> to vector<16x3xf32>
    %25 = vector.extract_strided_slice %21 {offsets = [0, 10], sizes = [16, 1], strides = [1, 1]} : vector<16x128xf32> to vector<16x1xf32>
    %c0_17 = arith.constant 0 : index
    %c0_18 = arith.constant 0 : index
    %26 = vector.load %arg3[%c0_17, %c0_18] : memref<16x7xf32, #tpu.memory_space<vmem>>, vector<16x7xf32>
    %c0_19 = arith.constant 0 : index
    %c0_20 = arith.constant 0 : index
    %27 = vector.load %arg4[%c0_19, %c0_20] : memref<16x1xi32, #tpu.memory_space<vmem>>, vector<16x1xi32>
    %28 = vector.extract_strided_slice %3 {offsets = [0, 3], sizes = [16, 3], strides = [1, 1]} : vector<16x7xf32> to vector<16x3xf32>
    %29 = vector.extract_strided_slice %26 {offsets = [0, 0], sizes = [16, 3], strides = [1, 1]} : vector<16x7xf32> to vector<16x3xf32>
    %30 = vector.extract_strided_slice %26 {offsets = [0, 3], sizes = [16, 3], strides = [1, 1]} : vector<16x7xf32> to vector<16x3xf32>
    %31 = vector.extract_strided_slice %26 {offsets = [0, 6], sizes = [16, 1], strides = [1, 1]} : vector<16x7xf32> to vector<16x1xf32>
    %32 = arith.divf %29, %28 : vector<16x3xf32>
    %33 = arith.divf %30, %28 : vector<16x3xf32>
    %34 = math.log %33 : vector<16x3xf32>
    %35 = math.exp %24 : vector<16x3xf32>
    %36 = arith.mulf %35, %28 : vector<16x3xf32>
    %37 = arith.mulf %23, %28 : vector<16x3xf32>
    %cst_21 = arith.constant 5.000000e-01 : f32
    %38 = vector.broadcast %cst_21 : f32 to vector<16x3xf32>
    %39 = arith.mulf %38, %30 : vector<16x3xf32>
    %40 = arith.subf %29, %39 : vector<16x3xf32>
    %cst_22 = arith.constant 5.000000e-01 : f32
    %41 = vector.broadcast %cst_22 : f32 to vector<16x3xf32>
    %42 = arith.mulf %41, %36 : vector<16x3xf32>
    %43 = arith.subf %37, %42 : vector<16x3xf32>
    %44 = arith.maximumf %40, %43 : vector<16x3xf32>
    %cst_23 = arith.constant 5.000000e-01 : f32
    %45 = vector.broadcast %cst_23 : f32 to vector<16x3xf32>
    %46 = arith.mulf %45, %30 : vector<16x3xf32>
    %47 = arith.addf %29, %46 : vector<16x3xf32>
    %cst_24 = arith.constant 5.000000e-01 : f32
    %48 = vector.broadcast %cst_24 : f32 to vector<16x3xf32>
    %49 = arith.mulf %48, %36 : vector<16x3xf32>
    %50 = arith.addf %37, %49 : vector<16x3xf32>
    %51 = arith.minimumf %47, %50 : vector<16x3xf32>
    %52 = arith.subf %51, %44 : vector<16x3xf32>
    %cst_25 = arith.constant 0.000000e+00 : f32
    %53 = vector.broadcast %cst_25 : f32 to vector<16x3xf32>
    %54 = arith.maximumf %52, %53 : vector<16x3xf32>
    %55 = vector.extract_strided_slice %54 {offsets = [0, 0], sizes = [16, 1], strides = [1, 1]} : vector<16x3xf32> to vector<16x1xf32>
    %56 = vector.extract_strided_slice %54 {offsets = [0, 1], sizes = [16, 1], strides = [1, 1]} : vector<16x3xf32> to vector<16x1xf32>
    %57 = arith.mulf %55, %56 : vector<16x1xf32>
    %58 = vector.extract_strided_slice %54 {offsets = [0, 2], sizes = [16, 1], strides = [1, 1]} : vector<16x3xf32> to vector<16x1xf32>
    %59 = arith.mulf %57, %58 : vector<16x1xf32>
    %60 = vector.extract_strided_slice %30 {offsets = [0, 0], sizes = [16, 1], strides = [1, 1]} : vector<16x3xf32> to vector<16x1xf32>
    %61 = vector.extract_strided_slice %30 {offsets = [0, 1], sizes = [16, 1], strides = [1, 1]} : vector<16x3xf32> to vector<16x1xf32>
    %62 = arith.mulf %60, %61 : vector<16x1xf32>
    %63 = vector.extract_strided_slice %30 {offsets = [0, 2], sizes = [16, 1], strides = [1, 1]} : vector<16x3xf32> to vector<16x1xf32>
    %64 = arith.mulf %62, %63 : vector<16x1xf32>
    %65 = vector.extract_strided_slice %36 {offsets = [0, 0], sizes = [16, 1], strides = [1, 1]} : vector<16x3xf32> to vector<16x1xf32>
    %66 = vector.extract_strided_slice %36 {offsets = [0, 1], sizes = [16, 1], strides = [1, 1]} : vector<16x3xf32> to vector<16x1xf32>
    %67 = arith.mulf %65, %66 : vector<16x1xf32>
    %68 = vector.extract_strided_slice %36 {offsets = [0, 2], sizes = [16, 1], strides = [1, 1]} : vector<16x3xf32> to vector<16x1xf32>
    %69 = arith.mulf %67, %68 : vector<16x1xf32>
    %70 = arith.addf %64, %69 : vector<16x1xf32>
    %71 = arith.subf %70, %59 : vector<16x1xf32>
    %cst_26 = arith.constant 1.000000e-07 : f32
    %72 = vector.broadcast %cst_26 : f32 to vector<16x1xf32>
    %73 = arith.maximumf %71, %72 : vector<16x1xf32>
    %74 = tpu.reciprocal %73 {approx = true} : vector<16x1xf32> -> vector<16x1xf32>
    %75 = arith.mulf %59, %74 : vector<16x1xf32>
    %cst_27 = arith.constant 2.000000e+00 : f32
    %76 = vector.broadcast %cst_27 : f32 to vector<16x1xf32>
    %77 = arith.mulf %76, %75 : vector<16x1xf32>
    %cst_28 = arith.constant 5.000000e-01 : f32
    %78 = vector.broadcast %cst_28 : f32 to vector<16x1xf32>
    %79 = arith.subf %77, %78 : vector<16x1xf32>
    %cst_29 = arith.constant 0.000000e+00 : f32
    %cst_30 = arith.constant 1.000000e+00 : f32
    %80 = vector.broadcast %cst_29 : f32 to vector<16x1xf32>
    %81 = arith.maximumf %80, %79 : vector<16x1xf32>
    %82 = vector.broadcast %cst_30 : f32 to vector<16x1xf32>
    %83 = arith.minimumf %82, %81 : vector<16x1xf32>
    %84 = tpu.iota {dimensions = array<i32: 1>} : vector<16x4xi32>
    %85 = vector.broadcast %27 : vector<16x1xi32> to vector<16x4xi32>
    %86 = arith.cmpi eq, %84, %85 : vector<16x4xi32>
    %87 = arith.extui %86 : vector<16x4xi1> to vector<16x4xi32>
    %88 = arith.sitofp %87 : vector<16x4xi32> to vector<16x4xf32>
    %89 = vector.broadcast %83 : vector<16x1xf32> to vector<16x4xf32>
    %90 = arith.mulf %88, %89 : vector<16x4xf32>
    %cst_31 = arith.constant dense<0xFF800000> : vector<16xf32>
    %91 = vector.multi_reduction <maximumf>, %22, %cst_31 [1] : vector<16x4xf32> to vector<16xf32>
    %92 = vector.shape_cast %91 : vector<16xf32> to vector<16x1xf32>
    %93 = vector.broadcast %92 : vector<16x1xf32> to vector<16x4xf32>
    %94 = arith.subf %22, %93 : vector<16x4xf32>
    %95 = math.exp %94 : vector<16x4xf32>
    %cst_32 = arith.constant dense<0.000000e+00> : vector<16xf32>
    %96 = vector.multi_reduction <add>, %95, %cst_32 [1] : vector<16x4xf32> to vector<16xf32>
    %97 = vector.shape_cast %96 : vector<16xf32> to vector<16x1xf32>
    %98 = math.log %97 : vector<16x1xf32>
    %99 = vector.broadcast %98 : vector<16x1xf32> to vector<16x4xf32>
    %100 = arith.subf %94, %99 : vector<16x4xf32>
    %101 = arith.mulf %90, %100 : vector<16x4xf32>
    %102 = vector.shape_cast %101 : vector<16x4xf32> to vector<1x16x4xf32>
    %cst_33 = arith.constant dense<0.000000e+00> : vector<1xf32>
    %103 = vector.multi_reduction <add>, %102, %cst_33 [1, 2] : vector<1x16x4xf32> to vector<1xf32>
    %104 = vector.shape_cast %103 : vector<1xf32> to vector<1x1x1xf32>
    %105 = vector.extract %104[0, 0, 0] : f32 from vector<1x1x1xf32>
    %cst_34 = arith.constant 0.000000e+00 : f32
    %106 = arith.subf %cst_34, %105 : f32
    %c0_i32_35 = arith.constant 0 : i32
    %107 = vector.broadcast %c0_i32_35 : i32 to vector<16x1xi32>
    %108 = arith.cmpi sgt, %27, %107 : vector<16x1xi32>
    %109 = arith.extui %108 : vector<16x1xi1> to vector<16x1xi32>
    %110 = arith.sitofp %109 : vector<16x1xi32> to vector<16x1xf32>
    %111 = arith.subf %23, %32 : vector<16x3xf32>
    %112 = math.absf %111 : vector<16x3xf32>
    %cst_36 = arith.constant 1.000000e+00 : f32
    %113 = vector.broadcast %cst_36 : f32 to vector<16x3xf32>
    %114 = arith.cmpf olt, %112, %113 : vector<16x3xf32>
    %cst_37 = arith.constant 5.000000e-01 : f32
    %115 = vector.broadcast %cst_37 : f32 to vector<16x3xf32>
    %116 = arith.mulf %115, %111 : vector<16x3xf32>
    %117 = arith.mulf %116, %111 : vector<16x3xf32>
    %cst_38 = arith.constant 5.000000e-01 : f32
    %118 = vector.broadcast %cst_38 : f32 to vector<16x3xf32>
    %119 = arith.subf %112, %118 : vector<16x3xf32>
    %120 = arith.select %114, %117, %119 : vector<16x3xi1>, vector<16x3xf32>
    %121 = vector.broadcast %110 : vector<16x1xf32> to vector<16x3xf32>
    %122 = arith.mulf %120, %121 : vector<16x3xf32>
    %123 = vector.shape_cast %122 : vector<16x3xf32> to vector<1x16x3xf32>
    %cst_39 = arith.constant dense<0.000000e+00> : vector<1xf32>
    %124 = vector.multi_reduction <add>, %123, %cst_39 [1, 2] : vector<1x16x3xf32> to vector<1xf32>
    %125 = vector.shape_cast %124 : vector<1xf32> to vector<1x1x1xf32>
    %126 = vector.extract %125[0, 0, 0] : f32 from vector<1x1x1xf32>
    %cst_40 = arith.constant 0.333333343 : f32
    %127 = arith.mulf %126, %cst_40 : f32
    %128 = arith.subf %24, %34 : vector<16x3xf32>
    %129 = math.absf %128 : vector<16x3xf32>
    %cst_41 = arith.constant 1.000000e+00 : f32
    %130 = vector.broadcast %cst_41 : f32 to vector<16x3xf32>
    %131 = arith.cmpf olt, %129, %130 : vector<16x3xf32>
    %cst_42 = arith.constant 5.000000e-01 : f32
    %132 = vector.broadcast %cst_42 : f32 to vector<16x3xf32>
    %133 = arith.mulf %132, %128 : vector<16x3xf32>
    %134 = arith.mulf %133, %128 : vector<16x3xf32>
    %cst_43 = arith.constant 5.000000e-01 : f32
    %135 = vector.broadcast %cst_43 : f32 to vector<16x3xf32>
    %136 = arith.subf %129, %135 : vector<16x3xf32>
    %137 = arith.select %131, %134, %136 : vector<16x3xi1>, vector<16x3xf32>
    %138 = vector.broadcast %110 : vector<16x1xf32> to vector<16x3xf32>
    %139 = arith.mulf %137, %138 : vector<16x3xf32>
    %140 = vector.shape_cast %139 : vector<16x3xf32> to vector<1x16x3xf32>
    %cst_44 = arith.constant dense<0.000000e+00> : vector<1xf32>
    %141 = vector.multi_reduction <add>, %140, %cst_44 [1, 2] : vector<1x16x3xf32> to vector<1xf32>
    %142 = vector.shape_cast %141 : vector<1xf32> to vector<1x1x1xf32>
    %143 = vector.extract %142[0, 0, 0] : f32 from vector<1x1x1xf32>
    %cst_45 = arith.constant 0.333333343 : f32
    %144 = arith.mulf %143, %cst_45 : f32
    %145 = arith.subf %25, %31 : vector<16x1xf32>
    %146 = math.absf %145 : vector<16x1xf32>
    %cst_46 = arith.constant 1.000000e+00 : f32
    %147 = vector.broadcast %cst_46 : f32 to vector<16x1xf32>
    %148 = arith.cmpf olt, %146, %147 : vector<16x1xf32>
    %cst_47 = arith.constant 5.000000e-01 : f32
    %149 = vector.broadcast %cst_47 : f32 to vector<16x1xf32>
    %150 = arith.mulf %149, %145 : vector<16x1xf32>
    %151 = arith.mulf %150, %145 : vector<16x1xf32>
    %cst_48 = arith.constant 5.000000e-01 : f32
    %152 = vector.broadcast %cst_48 : f32 to vector<16x1xf32>
    %153 = arith.subf %146, %152 : vector<16x1xf32>
    %154 = arith.select %148, %151, %153 : vector<16x1xi1>, vector<16x1xf32>
    %155 = arith.mulf %154, %110 : vector<16x1xf32>
    %156 = vector.shape_cast %155 : vector<16x1xf32> to vector<1x16x1xf32>
    %cst_49 = arith.constant dense<0.000000e+00> : vector<1xf32>
    %157 = vector.multi_reduction <add>, %156, %cst_49 [1, 2] : vector<1x16x1xf32> to vector<1xf32>
    %158 = vector.shape_cast %157 : vector<1xf32> to vector<1x1x1xf32>
    %159 = vector.extract %158[0, 0, 0] : f32 from vector<1x1x1xf32>
    %160 = vector.shape_cast %110 : vector<16x1xf32> to vector<1x16x1xf32>
    %cst_50 = arith.constant dense<0.000000e+00> : vector<1xf32>
    %161 = vector.multi_reduction <add>, %160, %cst_50 [1, 2] : vector<1x16x1xf32> to vector<1xf32>
    %162 = vector.shape_cast %161 : vector<1xf32> to vector<1x1x1xf32>
    %163 = vector.extract %162[0, 0, 0] : f32 from vector<1x1x1xf32>
    %c0_51 = arith.constant 0 : index
    %164 = memref.load %arg11[%c0_51] : memref<8xf32, #tpu.memory_space<smem>>
    %165 = arith.addf %164, %106 : f32
    %c0_52 = arith.constant 0 : index
    %166 = memref.load %arg11[%c0_52] : memref<8xf32, #tpu.memory_space<smem>>
    memref.store %165, %arg11[%c0_52] : memref<8xf32, #tpu.memory_space<smem>>
    %c1 = arith.constant 1 : index
    %167 = memref.load %arg11[%c1] : memref<8xf32, #tpu.memory_space<smem>>
    %168 = arith.addf %167, %127 : f32
    %c1_53 = arith.constant 1 : index
    %169 = memref.load %arg11[%c1_53] : memref<8xf32, #tpu.memory_space<smem>>
    memref.store %168, %arg11[%c1_53] : memref<8xf32, #tpu.memory_space<smem>>
    %c2 = arith.constant 2 : index
    %170 = memref.load %arg11[%c2] : memref<8xf32, #tpu.memory_space<smem>>
    %171 = arith.addf %170, %144 : f32
    %c2_54 = arith.constant 2 : index
    %172 = memref.load %arg11[%c2_54] : memref<8xf32, #tpu.memory_space<smem>>
    memref.store %171, %arg11[%c2_54] : memref<8xf32, #tpu.memory_space<smem>>
    %c3 = arith.constant 3 : index
    %173 = memref.load %arg11[%c3] : memref<8xf32, #tpu.memory_space<smem>>
    %174 = arith.addf %173, %159 : f32
    %c3_55 = arith.constant 3 : index
    %175 = memref.load %arg11[%c3_55] : memref<8xf32, #tpu.memory_space<smem>>
    memref.store %174, %arg11[%c3_55] : memref<8xf32, #tpu.memory_space<smem>>
    %c4 = arith.constant 4 : index
    %176 = memref.load %arg11[%c4] : memref<8xf32, #tpu.memory_space<smem>>
    %177 = arith.addf %176, %163 : f32
    %c4_56 = arith.constant 4 : index
    %178 = memref.load %arg11[%c4_56] : memref<8xf32, #tpu.memory_space<smem>>
    memref.store %177, %arg11[%c4_56] : memref<8xf32, #tpu.memory_space<smem>>
    %c0_i32_57 = arith.constant 0 : i32
    %179 = arith.cmpi eq, %arg0, %c0_i32_57 : i32
    %180 = arith.extui %179 : i1 to i32
    %c0_i32_58 = arith.constant 0 : i32
    %181 = arith.cmpi ne, %180, %c0_i32_58 : i32
    scf.if %181 {
      %c0_59 = arith.constant 0 : index
      %182 = memref.load %arg11[%c0_59] : memref<8xf32, #tpu.memory_space<smem>>
      %cst_60 = arith.constant 1.250000e-01 : f32
      %183 = arith.mulf %182, %cst_60 : f32
      %c4_61 = arith.constant 4 : index
      %184 = memref.load %arg11[%c4_61] : memref<8xf32, #tpu.memory_space<smem>>
      %cst_62 = arith.constant 9.99999974E-6 : f32
      %185 = arith.addf %184, %cst_62 : f32
      %cst_63 = arith.constant 1.000000e+00 : f32
      %186 = arith.divf %cst_63, %185 : f32
      %c1_64 = arith.constant 1 : index
      %187 = memref.load %arg11[%c1_64] : memref<8xf32, #tpu.memory_space<smem>>
      %188 = arith.mulf %187, %186 : f32
      %c2_65 = arith.constant 2 : index
      %189 = memref.load %arg11[%c2_65] : memref<8xf32, #tpu.memory_space<smem>>
      %190 = arith.mulf %189, %186 : f32
      %c3_66 = arith.constant 3 : index
      %191 = memref.load %arg11[%c3_66] : memref<8xf32, #tpu.memory_space<smem>>
      %192 = arith.mulf %191, %186 : f32
      %193 = arith.addf %188, %190 : f32
      %194 = arith.addf %193, %192 : f32
      %cst_67 = arith.constant 2.000000e+00 : f32
      %195 = arith.mulf %cst_67, %194 : f32
      %196 = arith.addf %183, %195 : f32
      %c0_68 = arith.constant 0 : index
      %197 = memref.load %arg10[%c0_68] : memref<8xf32, #tpu.memory_space<smem>>
      memref.store %196, %arg10[%c0_68] : memref<8xf32, #tpu.memory_space<smem>>
      %c1_69 = arith.constant 1 : index
      %198 = memref.load %arg10[%c1_69] : memref<8xf32, #tpu.memory_space<smem>>
      memref.store %183, %arg10[%c1_69] : memref<8xf32, #tpu.memory_space<smem>>
      %c2_70 = arith.constant 2 : index
      %199 = memref.load %arg10[%c2_70] : memref<8xf32, #tpu.memory_space<smem>>
      memref.store %188, %arg10[%c2_70] : memref<8xf32, #tpu.memory_space<smem>>
      %c3_71 = arith.constant 3 : index
      %200 = memref.load %arg10[%c3_71] : memref<8xf32, #tpu.memory_space<smem>>
      memref.store %190, %arg10[%c3_71] : memref<8xf32, #tpu.memory_space<smem>>
      %c4_72 = arith.constant 4 : index
      %201 = memref.load %arg10[%c4_72] : memref<8xf32, #tpu.memory_space<smem>>
      memref.store %192, %arg10[%c4_72] : memref<8xf32, #tpu.memory_space<smem>>
      %c4_73 = arith.constant 4 : index
      %202 = memref.load %arg11[%c4_73] : memref<8xf32, #tpu.memory_space<smem>>
      %c5 = arith.constant 5 : index
      %203 = memref.load %arg10[%c5] : memref<8xf32, #tpu.memory_space<smem>>
      memref.store %202, %arg10[%c5] : memref<8xf32, #tpu.memory_space<smem>>
      %cst_74 = arith.constant 0.000000e+00 : f32
      %c6 = arith.constant 6 : index
      %204 = memref.load %arg10[%c6] : memref<8xf32, #tpu.memory_space<smem>>
      memref.store %cst_74, %arg10[%c6] : memref<8xf32, #tpu.memory_space<smem>>
      %cst_75 = arith.constant 0.000000e+00 : f32
      %c7 = arith.constant 7 : index
      %205 = memref.load %arg10[%c7] : memref<8xf32, #tpu.memory_space<smem>>
      memref.store %cst_75, %arg10[%c7] : memref<8xf32, #tpu.memory_space<smem>>
    } else {
    }
    return
  }
  func.func @transform_0(%arg0: i32) -> (i32, i32) {
    %c0_i32 = arith.constant 0 : i32
    %c0_i32_0 = arith.constant 0 : i32
    return %arg0, %c0_i32 : i32, i32
  }
  func.func @transform_1(%arg0: i32) -> (i32, i32) {
    %c0_i32 = arith.constant 0 : i32
    %c0_i32_0 = arith.constant 0 : i32
    return %arg0, %c0_i32 : i32, i32
  }
  func.func @transform_2(%arg0: i32) -> (i32, i32) {
    %c0_i32 = arith.constant 0 : i32
    %c0_i32_0 = arith.constant 0 : i32
    return %arg0, %c0_i32 : i32, i32
  }
  func.func @transform_3(%arg0: i32) -> (i32, i32) {
    %c0_i32 = arith.constant 0 : i32
    %c0_i32_0 = arith.constant 0 : i32
    return %arg0, %c0_i32 : i32, i32
  }
  func.func @transform_4(%arg0: i32) -> (i32, i32) {
    %c0_i32 = arith.constant 0 : i32
    %c0_i32_0 = arith.constant 0 : i32
    %c0_i32_1 = arith.constant 0 : i32
    return %c0_i32, %c0_i32_0 : i32, i32
  }
  func.func @transform_5(%arg0: i32) -> (i32, i32) {
    %c0_i32 = arith.constant 0 : i32
    %c0_i32_0 = arith.constant 0 : i32
    %c0_i32_1 = arith.constant 0 : i32
    return %c0_i32, %c0_i32_0 : i32, i32
  }
  func.func @transform_6(%arg0: i32) -> (i32, i32) {
    %c0_i32 = arith.constant 0 : i32
    %c0_i32_0 = arith.constant 0 : i32
    %c0_i32_1 = arith.constant 0 : i32
    return %c0_i32, %c0_i32_0 : i32, i32
  }
  func.func @transform_7(%arg0: i32) -> (i32, i32) {
    %c0_i32 = arith.constant 0 : i32
    %c0_i32_0 = arith.constant 0 : i32
    %c0_i32_1 = arith.constant 0 : i32
    return %c0_i32, %c0_i32_0 : i32, i32
  }
  func.func @transform_8(%arg0: i32) -> (i32, i32) {
    %c0_i32 = arith.constant 0 : i32
    %c0_i32_0 = arith.constant 0 : i32
    %c0_i32_1 = arith.constant 0 : i32
    return %c0_i32, %c0_i32_0 : i32, i32
  }
  func.func @transform_9(%arg0: i32) -> i32 {
    %c0_i32 = arith.constant 0 : i32
    %c0_i32_0 = arith.constant 0 : i32
    return %c0_i32 : i32
  }
}

</mosaic_0001>

<bundles_post_ra>
// kernel: full_model_forward.1
= control target key start
LH: loop header
LB: loop body
LE: loop exit
PB: predicated region body
PF: predicated region fallthrough
CT: control target
= control target key end

     0   :  { %vm75_vm0 = vcmask 1046528   ;;  %vm68_vm1 = vcmask 56320   ;;  %v1031_v4 = vmov 0.0   ;;  %vm1032_vm2 = vmmov 0   ;;  %s1312_s0 = inlined_call_operand.vmem [shape: f32[16,64], index: 0, kind: input, shape index: {}]   ;;  %s1313_s1 = inlined_call_operand.vmem [shape: f32[16,7], index: 1, kind: input, shape index: {}]   ;;  %s1314_s2 = inlined_call_operand.vmem [shape: f32[16,7], index: 2, kind: input, shape index: {}]   ;;  %s1315_s3 = inlined_call_operand.vmem [shape: s32[16,1], index: 3, kind: input, shape index: {}]   ;;  %s1316_s4 = inlined_call_operand.vmem [shape: bf16[64,128], index: 4, kind: input, shape index: {}]   ;;  %s1317_s5 = inlined_call_operand.vmem [shape: f32[7,128], index: 5, kind: input, shape index: {}]   ;;  %s1318_s6 = inlined_call_operand.vmem [shape: f32[1,128], index: 6, kind: input, shape index: {}]   ;;  %s1319_s7 = inlined_call_operand.vmem [shape: bf16[128,128], index: 7, kind: input, shape index: {}]   ;;  %s1320_s8 = inlined_call_operand.vmem [shape: f32[1,128], index: 8, kind: input, shape index: {}]   ;;  %s1321_s9 = inlined_call_operand.vmem [shape: f32[8], index: 9, kind: output, shape index: {}]  }
   0x1   :  { %v67_v0 = vld [vmem:[%s1317_s5] sm:$0x7f]  ;;  %v1107_v2 = vld [vmem:[%s1313_s1 + $0x8] sm:$0xff]  ;;  %916 = vmatprep.subr.bf16.mxu0 %v1031_v4  ;;  %932 = vmatprep.mubr.msk.bf16.mxu0 %vm1032_vm2, %v1031_v4  ;;  %v977_v6 = vld [vmem:[%s1316_s4 + $0x10] sm:$0xff]  }
   0x2   :  { %v1102_v1 = vld [vmem:[%s1313_s1] sm:$0xff]  ;;  %899 = vmatprep.subr.msk.mxu1 %vm75_vm0, %v67_v0  ;;  %v976_v5 = vld [vmem:[%s1316_s4 + $0x8] sm:$0xff]  }
   0x3   :  { %901 = vmatprep.mubr.msk.f32.mxu1 %vm68_vm1, %v1102_v1  ;;  %v975_v3 = vld [vmem:[%s1316_s4] sm:$0xff]   ;;  %900 = vmatpush3.msk.msra.mxu1 %vm75_vm0, %v67_v0 }
   0x4   :  { %902 = vmatmul.mubr.msk.f32.vlgmr.msra.gmra.mrb[0].mxu1 %vm68_vm1, %v1107_v2  ;;  %904 = vmatprep.subr.bf16.mxu1 %v1031_v4  ;;  %v979_v7 = vld [vmem:[%s1319_s7] sm:$0xff]  }
   0x5   :  { %905 = vmatpush3.bf16.msra.mxu1 %v975_v3  ;;  %912 = vmatprep.mubr.msk.bf16.mxu1 %vm1032_vm2, %v1031_v4 }
   0x6   :  { %906 = vmatprep.subr.bf16.mxu1 %v1031_v4  ;;  %917 = vmatpush3.bf16.msra.mxu0 %v979_v7 }
   0x7   :  { %918 = vmatprep.subr.bf16.mxu0 %v1031_v4 }
   0x9   :  { %907 = vmatpush3.bf16.msra.mxu1 %v976_v5 }
   0xa   :  { %908 = vmatprep.subr.bf16.mxu1 %v1031_v4 }
   0xb   :  { %14 = vsyncpa [#allocation4], 0  ;;  %v978_v8 = vld [vmem:[%s1316_s4 + $0x18] sm:$0xff]   ;;  %v56_v9 = vld [vmem:[%s1312_s0] sm:$0xff]  ;;  %vm178_vm3 = vcmask 523264   ;;  %s1033_s17 = smov 1  }
   0xc   :  { %v57_v10 = vld [vmem:[%s1312_s0 + $0x8] sm:$0xff]  ;;  %v981_v13 = vld [vmem:[%s1319_s7 + $0x10] sm:$0xff]   ;;  %v982_v14 = vld [vmem:[%s1319_s7 + $0x18] sm:$0xff]   ;;  %381 = vrot.lane.b32.xlu1 %v1102_v1, %s1033_s17  ;;  %s1034_s1 = smov 4   ;;  %s1035_s23 = smov 125   ;;  %vm563_vm4 = vcmask 31744  }
   0xd   :  { %909 = vmatpush3.bf16.msra.mxu1 %v977_v6  ;;  %v58_v11 = vpack.c.bf16 %v57_v10, %v56_v9  ;;  %v980_v12 = vld [vmem:[%s1319_s7 + $0x8] sm:$0xff]   ;;  %v983_v15 = vld [vmem:[%s1319_s7 + $0x20] sm:$0xff]   ;;  %v985_v17 = vld [vmem:[%s1319_s7 + $0x30] sm:$0xff]   ;;  %373 = vrot.lane.b32.xlu0 %v1102_v1, %s1034_s1  ;;  %s1037_s24 = smov 127   ;;  %s1038_s25 = smov 126   ;;  %vm651_vm15 = vcmask 23552  }
   0xe   :  { %910 = vmatprep.subr.bf16.mxu1 %v1031_v4  ;;  %919 = vmatpush3.bf16.msra.mxu0 %v980_v12  ;;  %v984_v16 = vld [vmem:[%s1319_s7 + $0x28] sm:$0xff]   ;;  %v986_v18 = vld [vmem:[%s1319_s7 + $0x38] sm:$0xff]   ;;  %v851_v22 = vld [vmem:[%s1318_s6] ss:$0 sm:$0xff]  ;;  %s1039_s26 = smov 3   ;;  %s1042_s30 = smov 121  }
   0xf   :  { %920 = vmatprep.subr.bf16.mxu0 %v1031_v4  ;;  %v852_v33 = vld [vmem:[%s1320_s8] ss:$0 sm:$0xff]  ;;  %v1193_v50 = vld [vmem:[%s1314_s2 + $0x8] sm:$0xff]  ;;  %s1043_s0 = smov 118   ;;  %vm746_vm0 = vcmask 7168   ;;  %s1044_s10 = smov 0.0  }
  0x10   :  { %383 = vrot.lane.b32.xlu1 %v1107_v2, %s1033_s17  ;;  %v1188_v47 = vld [vmem:[%s1314_s2] sm:$0xff]  ;;  %v390_v53 = vmul.f32 0.5, %v1193_v50  ;;  %s1036_s2 = smov 124   ;;  %825 = sst [smem:[#allocation3 + $0x6]] %s1044_s10 }
  0x11   :  { %911 = vmatpush3.bf16.msra.mxu1 %v978_v8  ;;  %375 = vrot.lane.b32.xlu0 %v1107_v2, %s1034_s1  ;;  %v389_v52 = vmul.f32 0.5, %v1188_v47  ;;  %827 = sst [smem:[#allocation3 + $0x7]] %s1044_s10 }
  0x12   :  { %921 = vmatpush3.bf16.msra.mxu0 %v981_v13 }
  0x13   :  { %922 = vmatprep.subr.bf16.mxu0 %v1031_v4 }
  0x14   :  { %913 = vmatmul.mubr.msk.bf16.vlgmr.msra.gmra.mrb[4].mxu1 %vm178_vm3, %v58_v11 }
  0x16   :  { %923 = vmatpush3.bf16.msra.mxu0 %v982_v14 }
  0x17   :  { %924 = vmatprep.subr.bf16.mxu0 %v1031_v4 }
  0x1a   :  { %925 = vmatpush3.bf16.msra.mxu0 %v983_v15 }
  0x1b   :  { %926 = vmatprep.subr.bf16.mxu0 %v1031_v4 }
  0x1e   :  { %927 = vmatpush3.bf16.msra.mxu0 %v984_v16 }
  0x1f   :  { %928 = vmatprep.subr.bf16.mxu0 %v1031_v4 }
  0x22   :  { %929 = vmatpush3.bf16.msra.mxu0 %v985_v17 }
  0x23   :  { %930 = vmatprep.subr.bf16.mxu0 %v1031_v4 }
  0x26   :  { %931 = vmatpush3.bf16.msra.mxu0 %v986_v18 }
  0x7e   :  { %v382_v54 = vpop.permute.xlu1 %381 }
  0x7f   :  { %v374_v42 = vpop.permute.xlu0 %373 }
  0x82   :  { %v384_v55 = vpop.permute.xlu1 %383 }
  0x83   :  { %v376_v44 = vpop.permute.xlu0 %375 }
  0xd7   :  { %v903_v19 = vpop.f32.mrb[0].mxu1 }
  0xd8   :  { %v145_v20 = vpop.f32.mrb[1].mxu1 }
  0xe7   :  { %v216_v21 = vpop.f32.mrb[4].mxu1 }
  0xe8   :  { %v217_v23 = vadd.f32 %v216_v21, %v145_v20  ;;  %v914_v24 = vpop.f32.mrb[5].mxu1 }
  0xe9   :  { %v219_v25 = vpop.f32.mrb[6].mxu1 }
  0xea   :  { %v230_v26 = vadd.f32 %v851_v22, %v217_v23  ;;  %v220_v27 = vadd.f32 %v903_v19, %v219_v25  ;;  %v915_v28 = vpop.f32.mrb[7].mxu1 }
  0xec   :  { %v231_v29 = vadd.f32 %v851_v22, %v220_v27  ;;  %v232_v30 = vmax.f32 %v230_v26, 0.0 }
  0xee   :  { %v233_v31 = vmax.f32 %v231_v29, 0.0 }
  0xf0   :  { %v234_v32 = vpack.c.bf16 %v233_v31, %v232_v30 }
  0xf2   :  { %933 = vmatmul.mubr.bf16.vlgmr.msra.gmra.mrb[0].mxu0 %v234_v32 }
 0x1c5   :  { %v340_v34 = vpop.f32.mrb[0].mxu0 }
 0x1c6   :  { %v1179_v35 = vadd.f32 %v852_v33, %v340_v34  ;;  %v934_v36 = vpop.f32.mrb[1].mxu0 }
 0x1c7   :  { %v343_v37 = vpop.f32.mrb[2].mxu0 }
 0x1c8   :  { %v1181_v38 = vadd.f32 %v852_v33, %v343_v37  ;;  %v935_v39 = vpop.f32.mrb[3].mxu0  ;;  %v369_v40 = vmul.f32 1.442695, %v1179_v35  ;;  %v387_v56 = vmul.f32 %v382_v54, %v1179_v35 }
 0x1c9   :  { %v1040_v39 = vmov 0  }
 0x1ca   :  { %987 = vpow2.f32 %v369_v40  ;;  %v371_v41 = vmul.f32 1.442695, %v1181_v38  ;;  %v388_v58 = vmul.f32 %v384_v55, %v1181_v38  ;;  %963 = vset.pattern.permute.xlu0 %v1040_v39  ;;  %974 = vset.pattern.permute.xlu1 %v1040_v39  ;;  %v564_v40 = vsel %vm563_vm4, %v1179_v35, -inf }
 0x1cc   :  { %989 = vpow2.f32 %v371_v41  ;;  %v567_v41 = vsel %vm563_vm4, %v1181_v38, -inf }
 0x1cd   :  { %991 = vrcp.f32 %v1102_v1 }
 0x1ce   :  { %993 = vrcp.f32 %v1107_v2 }
 0x1d4   :  { %v988_v43 = vpop.eup %987 }
 0x1d5   :  { %v379_v45 = vmul.f32 %v988_v43, %v374_v42 }
 0x1d6   :  { %v990_v46 = vpop.eup %989 }
 0x1d7   :  { %v380_v48 = vmul.f32 %v990_v46, %v376_v44  ;;  %v401_v49 = vmul.f32 0.5, %v379_v45 }
 0x1d9   :  { %405 = vrot.lane.b32.xlu0 %v401_v49, %s1035_s23  ;;  %v402_v51 = vmul.f32 0.5, %v380_v48 }
 0x1db   :  { %407 = vrot.lane.b32.xlu1 %v402_v51, %s1035_s23 }
 0x1dd   :  { %393 = vrot.lane.b32.xlu0 %v389_v52, %s1035_s23 }
 0x1df   :  { %395 = vrot.lane.b32.xlu1 %v390_v53, %s1035_s23 }
 0x24b   :  { %v406_v57 = vpop.permute.xlu0 %405 }
 0x24c   :  { %v411_v59 = vsub.f32 %v387_v56, %v406_v57  ;;  %v425_v62 = vadd.f32 %v406_v57, %v387_v56 }
 0x24d   :  { %v408_v60 = vpop.permute.xlu1 %407 }
 0x24e   :  { %v412_v61 = vsub.f32 %v388_v58, %v408_v60  ;;  %415 = vrot.lane.b32.xlu0 %v411_v59, %s1036_s2  ;;  %v426_v63 = vadd.f32 %v408_v60, %v388_v58  ;;  %v992_v58 = vpop.eup %991 }
 0x24f   :  { %v394_v0 = vpop.permute.xlu0 %393 }
 0x250   :  { %417 = vrot.lane.b32.xlu1 %v412_v61, %s1036_s2  ;;  %v399_v7 = vsub.f32 %v1188_v47, %v394_v0  ;;  %v423_v8 = vadd.f32 %v394_v0, %v1188_v47  ;;  %v349_v0 = vld [vmem:[%s1315_s3] sm:$0xff] }
 0x251   :  { %v396_v3 = vpop.permute.xlu1 %395  ;;  %vm603_vm5 = vcmp.gt.s32.totalorder %v349_v0, 0 }
 0x252   :  { %429 = vrot.lane.b32.xlu0 %v425_v62, %s1036_s2  ;;  %v400_v9 = vsub.f32 %v1193_v50, %v396_v3  ;;  %v424_v10 = vadd.f32 %v396_v3, %v1193_v50  ;;  %v350_v3 = vld [vmem:[%s1315_s3 + $0x8] sm:$0xff]  ;;  %s1041_s3 = smov 10  }
 0x253   :  { %vm604_vm6 = vcmp.gt.s32.totalorder %v350_v3, 0 }
 0x254   :  { %431 = vrot.lane.b32.xlu1 %v426_v63, %s1036_s2  ;;  %v362_v63 = vmul.f32 %v992_v58, %v1188_v47 }
 0x256   :  { %479 = vrot.lane.b32.xlu0 %v379_v45, %s1037_s24 }
 0x258   :  { %481 = vrot.lane.b32.xlu1 %v380_v48, %s1037_s24 }
 0x25a   :  { %487 = vrot.lane.b32.xlu0 %v379_v45, %s1038_s25 }
 0x25c   :  { %489 = vrot.lane.b32.xlu1 %v380_v48, %s1038_s25 }
 0x2c0   :  { %v416_v5 = vpop.permute.xlu0 %415 }
 0x2c1   :  { %v421_v12 = vmax.f32 %v399_v7, %v416_v5 }
 0x2c2   :  { %v418_v6 = vpop.permute.xlu1 %417 }
 0x2c3   :  { %v422_v15 = vmax.f32 %v400_v9, %v418_v6  ;;  %v1259_v9 = vsel %vm604_vm6, 1.0, %v1031_v4 }
 0x2c4   :  { %v430_v11 = vpop.permute.xlu0 %429 }
 0x2c5   :  { %v435_v13 = vmin.f32 %v423_v8, %v430_v11  ;;  %v1256_v8 = vsel %vm603_vm5, 1.0, %v1031_v4 }
 0x2c6   :  { %v432_v14 = vpop.permute.xlu1 %431 }
 0x2c7   :  { %v437_v16 = vsub.f32 %v435_v13, %v421_v12  ;;  %v436_v17 = vmin.f32 %v424_v10, %v432_v14  ;;  %v964_v13 = vpack.i.bf16 %v1259_v9, %v1256_v8 }
 0x2c8   :  { %v480_v21 = vpop.permute.xlu0 %479 }
 0x2c9   :  { %v439_v18 = vmax.f32 %v437_v16, 0.0  ;;  %v438_v19 = vsub.f32 %v436_v17, %v422_v15  ;;  %v485_v24 = vmul.f32 %v480_v21, %v379_v45 }
 0x2ca   :  { %v482_v22 = vpop.permute.xlu1 %481 }
 0x2cb   :  { %v440_v20 = vmax.f32 %v438_v19, 0.0  ;;  %443 = vrot.lane.b32.xlu0 %v439_v18, %s1037_s24  ;;  %v486_v26 = vmul.f32 %v482_v22, %v380_v48 }
 0x2cc   :  { %v488_v23 = vpop.permute.xlu0 %487 }
 0x2cd   :  { %445 = vrot.lane.b32.xlu1 %v440_v20, %s1037_s24  ;;  %v493_v27 = vmul.f32 %v488_v23, %v485_v24 }
 0x2ce   :  { %v490_v25 = vpop.permute.xlu1 %489 }
 0x2cf   :  { %451 = vrot.lane.b32.xlu0 %v439_v18, %s1038_s25  ;;  %v494_v28 = vmul.f32 %v490_v25, %v486_v26 }
 0x2d1   :  { %453 = vrot.lane.b32.xlu1 %v440_v20, %s1038_s25 }
 0x2d3   :  { %461 = vrot.lane.b32.xlu0 %v1188_v47, %s1037_s24 }
 0x2d5   :  { %463 = vrot.lane.b32.xlu1 %v1193_v50, %s1037_s24 }
 0x2d7   :  { %469 = vrot.lane.b32.xlu0 %v1188_v47, %s1038_s25 }
 0x2d9   :  { %471 = vrot.lane.b32.xlu1 %v1193_v50, %s1038_s25 }
 0x2db   :  { %497 = vrot.lane.b32.xlu0 %v493_v27, %s1036_s2 }
 0x2dd   :  { %499 = vrot.lane.b32.xlu1 %v494_v28, %s1036_s2 }
 0x33d   :  { %v444_v29 = vpop.permute.xlu0 %443 }
 0x33e   :  { %v449_v31 = vmul.f32 %v444_v29, %v439_v18 }
 0x33f   :  { %v446_v30 = vpop.permute.xlu1 %445 }
 0x340   :  { %v450_v33 = vmul.f32 %v446_v30, %v440_v20 }
 0x341   :  { %v452_v32 = vpop.permute.xlu0 %451 }
 0x342   :  { %v1229_v34 = vmul.f32 %v452_v32, %v449_v31 }
 0x343   :  { %v454_v36 = vpop.permute.xlu1 %453 }
 0x344   :  { %v1231_v37 = vmul.f32 %v454_v36, %v450_v33  ;;  %507 = vrot.lane.b32.xlu0 %v1229_v34, %s1039_s26 }
 0x345   :  { %v462_v42 = vpop.permute.xlu0 %461 }
 0x346   :  { %509 = vrot.lane.b32.xlu1 %v1231_v37, %s1039_s26  ;;  %v467_v49 = vmul.f32 %v462_v42, %v1188_v47 }
 0x347   :  { %v464_v43 = vpop.permute.xlu1 %463 }
 0x348   :  { %351 = vrot.lane.b32.xlu0 %v1102_v1, %s1035_s23  ;;  %v468_v46 = vmul.f32 %v464_v43, %v1193_v50  ;;  %v994_v1 = vpop.eup %993 }
 0x349   :  { %v470_v44 = vpop.permute.xlu0 %469  ;;  %v364_v5 = vmul.f32 %v994_v1, %v1193_v50 }
 0x34a   :  { %353 = vrot.lane.b32.xlu1 %v1107_v2, %s1035_s23  ;;  %v475_v54 = vmul.f32 %v470_v44, %v467_v49 }
 0x34b   :  { %v472_v45 = vpop.permute.xlu1 %471 }
 0x34c   :  { %v476_v52 = vmul.f32 %v472_v45, %v468_v46 }
 0x34d   :  { %v498_v48 = vpop.permute.xlu0 %497 }
 0x34e   :  { %v503_v59 = vadd.f32 %v498_v48, %v475_v54 }
 0x34f   :  { %v500_v51 = vpop.permute.xlu1 %499 }
 0x350   :  { %v504_v56 = vadd.f32 %v500_v51, %v476_v52 }
 0x367   :  { %565 = vmax.xlane.f32.xlu0 %v564_v40 }
 0x36e   :  { %568 = vmax.xlane.f32.xlu1 %v567_v41 }
 0x3b6   :  { %v508_v53 = vpop.permute.xlu0 %507 }
 0x3b7   :  { %v513_v62 = vsub.f32 %v503_v59, %v508_v53 }
 0x3b8   :  { %v510_v55 = vpop.permute.xlu1 %509 }
 0x3b9   :  { %v514_v60 = vsub.f32 %v504_v56, %v510_v55  ;;  %v515_v6 = vmax.f32 %v513_v62, 1e-07 }
 0x3ba   :  { %v352_v57 = vpop.permute.xlu0 %351 }
 0x3bb   :  { %995 = vrcp.f32 %v352_v57  ;;  %v516_v2 = vmax.f32 %v514_v60, 1e-07 }
 0x3bc   :  { %v354_v61 = vpop.permute.xlu1 %353 }
 0x3bd   :  { %997 = vrcp.f32 %v354_v61 }
 0x3be   :  { %999 = vlog2.f32 %v362_v63 }
 0x3bf   :  { %1001 = vrcp.f32 %v516_v2 }
 0x3c0   :  { %1003 = vlog2.f32 %v364_v5 }
 0x3c1   :  { %1005 = vrcp.f32 %v515_v6 }
 0x3c5   :  { %v996_v7 = vpop.eup %995 }
 0x3c6   :  { %v358_v10 = vmul.f32 %v996_v7, %v1188_v47 }
 0x3c7   :  { %v998_v11 = vpop.eup %997 }
 0x3c8   :  { %611 = vrot.lane.b32.xlu0 %v358_v10, %s1034_s1  ;;  %v360_v12 = vmul.f32 %v998_v11, %v1193_v50  ;;  %v1000_v14 = vpop.eup %999 }
 0x3c9   :  { %v1002_v15 = vpop.eup %1001  ;;  %v366_v17 = vmul.f32 0.6931472, %v1000_v14 }
 0x3ca   :  { %613 = vrot.lane.b32.xlu1 %v360_v12, %s1034_s1  ;;  %v1004_v16 = vpop.eup %1003 }
 0x3cb   :  { %v1006_v18 = vpop.eup %1005  ;;  %v368_v19 = vmul.f32 0.6931472, %v1004_v16 }
 0x3cc   :  { %965 = vperm.xlu0 %963, %v964_v13  }
 0x3ce   :  { %523 = vrot.lane.b32.xlu1 %v1002_v15, %s1035_s23 }
 0x3d0   :  { %521 = vrot.lane.b32.xlu0 %v1006_v18, %s1035_s23 }
 0x3d2   :  { %667 = vrot.lane.b32.xlu1 %v366_v17, %s1034_s1 }
 0x3d4   :  { %710 = vrot.lane.b32.xlu0 %v1188_v47, %s1034_s1 }
 0x3d6   :  { %669 = vrot.lane.b32.xlu1 %v368_v19, %s1034_s1 }
 0x3d8   :  { %970 = vrot.lane.b32.xlu0 %v964_v13, %s1041_s3 }
 0x3da   :  { %712 = vrot.lane.b32.xlu1 %v1193_v50, %s1034_s1 }
 0x3f4   :  { %v566_v20 = vpop.xlane.xlu0 %565 }
 0x3f5   :  { %v1276_v21 = vsub.f32 %v1179_v35, %v566_v20 }
 0x3f7   :  { %v572_v22 = vmul.f32 1.442695, %v1276_v21 }
 0x3f9   :  { %1007 = vpow2.f32 %v572_v22 }
 0x3fb   :  { %v569_v23 = vpop.xlane.xlu1 %568 }
 0x3fc   :  { %v1280_v24 = vsub.f32 %v1181_v38, %v569_v23 }
 0x3fe   :  { %v574_v47 = vmul.f32 1.442695, %v1280_v24 }
 0x400   :  { %1009 = vpow2.f32 %v574_v47 }
 0x403   :  { %v1008_v25 = vpop.eup %1007 }
 0x404   :  { %v576_v26 = vsel %vm563_vm4, %v1008_v25, 0.0 }
 0x405   :  { %577 = vadd.xlane.f32.xlu1 %v576_v26 }
 0x40a   :  { %v1010_v27 = vpop.eup %1009 }
 0x40b   :  { %v579_v50 = vsel %vm563_vm4, %v1010_v27, 0.0 }
 0x40c   :  { %580 = vadd.xlane.f32.xlu0 %v579_v50 }
 0x416   :  { %543 = vperm.xlu1 %974, %v350_v3  }
 0x422   :  { %540 = vperm.xlu0 %963, %v349_v0  }
 0x43a   :  { %v612_v40 = vpop.permute.xlu0 %611 }
 0x43b   :  { %v617_v53 = vsub.f32 %v1179_v35, %v612_v40 }
 0x43c   :  { %v614_v28 = vpop.permute.xlu1 %613 }
 0x43d   :  { %v618_v30 = vsub.f32 %v1181_v38, %v614_v28  ;;  %v623_v1 = vmul.f32 0.5, %v617_v53  ;;  %v619_v3 = vand.u32 2147483647, %v617_v53 }
 0x43f   :  { %v620_v33 = vand.u32 2147483647, %v618_v30  ;;  %v624_v36 = vmul.f32 0.5, %v618_v30  ;;  %v625_v10 = vmul.f32 %v623_v1, %v617_v53  ;;  %v867_v15 = vadd.f32 -0.5, %v619_v3 }
 0x440   :  { %v524_v29 = vpop.permute.xlu1 %523  ;;  %vm621_vm10 = vcmp.lt.f32.partialorder %v619_v3, 1.0 }
 0x441   :  { %v528_v31 = vmul.f32 %v524_v29, %v1231_v37  ;;  %v626_v42 = vmul.f32 %v624_v36, %v618_v30  ;;  %v868_v43 = vadd.f32 -0.5, %v620_v33  ;;  %vm622_vm7 = vcmp.lt.f32.partialorder %v620_v33, 1.0 }
 0x442   :  { %v629_v27 = vsel %vm621_vm10, %v625_v10, %v867_v15 }
 0x443   :  { %v530_v39 = vmul.f32 2.0, %v528_v31  ;;  %v630_v37 = vsel %vm622_vm7, %v626_v42, %v868_v43  ;;  %v537_v42 = vlaneseq }
 0x444   :  { %v668_v32 = vpop.permute.xlu1 %667 }
 0x445   :  { %v862_v45 = vadd.f32 -0.5, %v530_v39  ;;  %v673_v5 = vsub.f32 %v1179_v35, %v668_v32 }
 0x447   :  { %v534_v54 = vmax.f32 %v862_v45, 0.0  ;;  %v675_v16 = vand.u32 2147483647, %v673_v5  ;;  %v679_v17 = vmul.f32 0.5, %v673_v5  ;;  %v538_v45 = vand.u32 127, %v537_v42 }
 0x448   :  { %v670_v41 = vpop.permute.xlu1 %669 }
 0x449   :  { %v674_v44 = vsub.f32 %v1181_v38, %v670_v41  ;;  %v536_v62 = vmin.f32 %v534_v54, 1.0  ;;  %v869_v26 = vadd.f32 -0.5, %v675_v16  ;;  %vm677_vm11 = vcmp.lt.f32.partialorder %v675_v16, 1.0 }
 0x44b   :  { %v676_v46 = vand.u32 2147483647, %v674_v44  ;;  %v680_v48 = vmul.f32 0.5, %v674_v44  ;;  %v966_v49 = vpop.permute.xlu0 %965 }
 0x44c   :  { %v968_v51 = vunpack.i.h.bf16 %v966_v49  ;;  %v713_v52 = vpop.permute.xlu1 %712  ;;  %v967_v19 = vunpack.i.l.bf16 %v966_v49 }
 0x44d   :  { %v717_v56 = vsub.f32 %v1181_v38, %v713_v52  ;;  %v682_v57 = vmul.f32 %v680_v48, %v674_v44  ;;  %v870_v58 = vadd.f32 -0.5, %v676_v46  ;;  %vm1290_vm8 = vcmp.lt.f32.partialorder %v676_v46, 1.0 }
 0x44e   :  { %v642_v55 = vmul.f32 %v968_v51, %v630_v37  ;;  %v641_v28 = vmul.f32 %v967_v19, %v629_v27 }
 0x44f   :  { %v522_v59 = vpop.permute.xlu0 %521  ;;  %v719_v63 = vand.u32 2147483647, %v717_v56  ;;  %v723_v2 = vmul.f32 0.5, %v717_v56  ;;  %v686_v38 = vsel %vm1290_vm8, %v682_v57, %v870_v58 }
 0x450   :  { %v527_v61 = vmul.f32 %v522_v59, %v1229_v34  ;;  %647 = vrot.lane.b32.xlu0 %v642_v55, %s1036_s2  ;;  %v688_v34 = vmul.f32 %v968_v51, %v686_v38 }
 0x451   :  { %v725_v12 = vmul.f32 %v723_v2, %v717_v56  ;;  %v872_v13 = vadd.f32 -0.5, %v719_v63  ;;  %vm721_vm9 = vcmp.lt.f32.partialorder %v719_v63, 1.0 }
 0x452   :  { %v529_v0 = vmul.f32 2.0, %v527_v61 }
 0x453   :  { %v711_v6 = vpop.permute.xlu0 %710  ;;  %v729_v25 = vsel %vm721_vm9, %v725_v12, %v872_v13 }
 0x454   :  { %v861_v7 = vadd.f32 -0.5, %v529_v0  ;;  %558 = vperm.xlu0 %963, %v536_v62   ;;  %v716_v11 = vsub.f32 %v1179_v35, %v711_v6  ;;  %v681_v35 = vmul.f32 %v679_v17, %v673_v5 }
 0x456   :  { %v533_v14 = vmax.f32 %v861_v7, 0.0  ;;  %v718_v22 = vand.u32 2147483647, %v716_v11  ;;  %v722_v23 = vmul.f32 0.5, %v716_v11  ;;  %v685_v31 = vsel %vm677_vm11, %v681_v35, %v869_v26 }
 0x457   :  { %v971_v18 = vpop.permute.xlu0 %970  ;;  %v687_v32 = vmul.f32 %v967_v19, %v685_v31  ;;  %v760_v7 = vsel %vm746_vm0, %v1259_v9, 0.0 }
 0x458   :  { %v535_v20 = vmin.f32 %v533_v14, 1.0  ;;  %693 = vrot.lane.b32.xlu0 %v688_v34, %s1042_s30  ;;  %v973_v47 = vunpack.i.h.bf16 %v971_v18  ;;  %v724_v29 = vmul.f32 %v722_v23, %v716_v11  ;;  %v871_v30 = vadd.f32 -0.5, %v718_v22 }
 0x459   :  { %vm720_vm12 = vcmp.lt.f32.partialorder %v718_v22, 1.0  ;;  %v972_v33 = vunpack.i.l.bf16 %v971_v18 }
 0x45a   :  { %553 = vperm.xlu1 %974, %v535_v20   ;;  %v737_v50 = vmul.f32 %v973_v47, %v729_v25  ;;  %v728_v36 = vsel %vm720_vm12, %v724_v29, %v871_v30 }
 0x45b   :  { %v736_v39 = vmul.f32 %v972_v33, %v728_v36 }
 0x45c   :  { %742 = vrot.lane.b32.xlu0 %v737_v50, %s1043_s0 }
 0x45e   :  { %645 = vrot.lane.b32.xlu1 %v641_v28, %s1036_s2  ;;  %s834_s2 = sshll.u32 %s1321_s9, 4  ;;  %s835_s2 = int_to_ptr.vmem [resolvable:$true] %s834_s2 }
 0x45f   :  { %s1017_s26 = scalar_lea.vmem %s835_s2, 16  ;;  %p1022_p1 = scmp.lt.s32.totalorder %s835_s2, %s835_s2 }
 0x460   :  { %p1018_p0 = scmp.ne.s32.totalorder %s835_s2, %s1017_s26  ;;  %p1023_p2 = scmp.lt.s32.totalorder %s1017_s26, %s1017_s26 }
 0x462   :  { %691 = vrot.lane.b32.xlu1 %v687_v32, %s1042_s30  ;;  %p1024_p3 = por %p1023_p2, %p1022_p1 }
 0x464   :  { %p1025_p4 = pnand %p1024_p3, %p1018_p0 }
 0x466   :  { %740 = vrot.lane.b32.xlu1 %v736_v39, %s1043_s0 }
 0x492   :  { %v578_v41 = vpop.xlane.xlu1 %577 }
 0x496   :  { %v544_v44 = vpop.permute.xlu1 %543 }
 0x497   :  { %vm546_vm13 = vcmp.eq.s32.totalorder %v538_v45, %v544_v44 }
 0x498   :  { %v864_v52 = vsel %vm546_vm13, 1.0, %v1031_v4 }
 0x499   :  { %v581_v40 = vpop.xlane.xlu0 %580 }
 0x49a   :  { %1011 = vlog2.f32 %v581_v40 }
 0x49b   :  { %1013 = vlog2.f32 %v578_v41 }
 0x4a1   :  { %v541_v43 = vpop.permute.xlu0 %540 }
 0x4a2   :  { %vm545_vm14 = vcmp.eq.s32.totalorder %v538_v45, %v541_v43 }
 0x4a3   :  { %v863_v56 = vsel %vm545_vm14, 1.0, %v1031_v4 }
 0x4a4   :  { %v1012_v48 = vpop.eup %1011 }
 0x4a5   :  { %v1014_v49 = vpop.eup %1013  ;;  %v585_v53 = vmul.f32 0.6931472, %v1012_v48 }
 0x4a6   :  { %v583_v37 = vmul.f32 0.6931472, %v1014_v49 }
 0x4a7   :  { %v587_v55 = vsub.f32 %v1280_v24, %v585_v53 }
 0x4a8   :  { %v586_v59 = vsub.f32 %v1276_v21, %v583_v37  ;;  %v759_v21 = vsel %vm746_vm0, %v1256_v8, 0.0 }
 0x4a9   :  { %v761_v12 = vadd.f32 %v760_v7, %v759_v21 }
 0x4c2   :  { %v648_v46 = vpop.permute.xlu0 %647 }
 0x4c3   :  { %v653_v63 = vsel %vm651_vm15, %v648_v46, 0.0 }
 0x4d3   :  { %v559_v51 = vpop.permute.xlu0 %558 }
 0x4d4   :  { %v562_v54 = vmul.f32 %v864_v52, %v559_v51 }
 0x4d6   :  { %v589_v58 = vmul.f32 %v587_v55, %v562_v54 }
 0x4d7   :  { %v694_v1 = vpop.permute.xlu0 %693 }
 0x4d8   :  { %v591_v3 = vsel %vm563_vm4, %v589_v58, 0.0  ;;  %v698_v24 = vsel %vm651_vm15, %v694_v1, 0.0 }
 0x4d9   :  { %v554_v57 = vpop.permute.xlu1 %553 }
 0x4da   :  { %v561_v60 = vmul.f32 %v863_v56, %v554_v57 }
 0x4db   :  { %v743_v10 = vpop.permute.xlu0 %742 }
 0x4dc   :  { %v588_v61 = vmul.f32 %v586_v59, %v561_v60  ;;  %v748_v13 = vsel %vm746_vm0, %v743_v10, 0.0 }
 0x4dd   :  { %v646_v62 = vpop.permute.xlu1 %645 }
 0x4de   :  { %v652_v2 = vsel %vm651_vm15, %v646_v62, 0.0  ;;  %v590_v0 = vsel %vm563_vm4, %v588_v61, 0.0 }
 0x4df   :  { %v592_v5 = vadd.f32 %v591_v3, %v590_v0  ;;  %v654_v38 = vadd.f32 %v653_v63, %v652_v2 }
 0x4e1   :  { %593 = vadd.xlane.f32.xlu1 %v592_v5  ;;  %655 = vadd.xlane.f32.xlu0 %v654_v38  ;;  %v692_v4 = vpop.permute.xlu1 %691 }
 0x4e2   :  { %v697_v6 = vsel %vm651_vm15, %v692_v4, 0.0 }
 0x4e3   :  { %v699_v11 = vadd.f32 %v698_v24, %v697_v6 }
 0x4e5   :  { %700 = vadd.xlane.f32.xlu0 %v699_v11  ;;  %v741_v34 = vpop.permute.xlu1 %740 }
 0x4e6   :  { %v747_v14 = vsel %vm746_vm0, %v741_v34, 0.0 }
 0x4e7   :  { %v749_v15 = vadd.f32 %v748_v13, %v747_v14 }
 0x4e9   :  { %762 = vadd.xlane.f32.xlu0 %v761_v12  ;;  %750 = vadd.xlane.f32.xlu1 %v749_v15 }
 0x56e   :  { %v656_v16 = vpop.xlane.xlu0 %655  ;;  %v594_v17 = vpop.xlane.xlu1 %593 }
 0x56f   :  { %v657_v18 = vrot.slane %v656_v16, 4  ;;  %v595_v19 = vrot.slane %v594_v17, 4 }
 0x571   :  { %v658_v20 = vadd.f32 %v657_v18, %v656_v16  ;;  %v596_v22 = vadd.f32 %v595_v19, %v594_v17 }
 0x572   :  { %v701_v23 = vpop.xlane.xlu0 %700 }
 0x573   :  { %v659_v8 = vrot.slane %v658_v20, 2  ;;  %v597_v47 = vrot.slane %v596_v22, 2  ;;  %v702_v9 = vrot.slane %v701_v23, 4 }
 0x575   :  { %v703_v25 = vadd.f32 %v702_v9, %v701_v23  ;;  %v598_v35 = vadd.f32 %v597_v47, %v596_v22  ;;  %v660_v26 = vadd.f32 %v659_v8, %v658_v20 }
 0x576   :  { %v763_v27 = vpop.xlane.xlu0 %762  ;;  %v751_v50 = vpop.xlane.xlu1 %750 }
 0x577   :  { %v704_v28 = vrot.slane %v703_v25, 2  ;;  %v764_v29 = vrot.slane %v763_v27, 4  ;;  %v752_v30 = vrot.slane %v751_v50, 4  ;;  %v599_v31 = vrot.slane %v598_v35, 1 }
 0x578   :  { %v661_v32 = vrot.slane %v660_v26, 1 }
 0x579   :  { %v765_v33 = vadd.f32 %v764_v29, %v763_v27  ;;  %v753_v36 = vadd.f32 %v752_v30, %v751_v50  ;;  %v600_v39 = vadd.f32 %v599_v31, %v598_v35  ;;  %v705_v40 = vadd.f32 %v704_v28, %v703_v25 }
 0x57a   :  { %v662_v41 = vadd.f32 %v661_v32, %v660_v26 }
 0x57b   :  { %v766_v42 = vrot.slane %v765_v33, 2  ;;  %v754_v43 = vrot.slane %v753_v36, 2  ;;  %936 = vpush %v600_v39  ;;  %v706_v44 = vrot.slane %v705_v40, 1 }
 0x57c   :  { %938 = vpush %v662_v41 }
 0x57d   :  { %v767_v45 = vadd.f32 %v766_v42, %v765_v33  ;;  %v755_v46 = vadd.f32 %v754_v43, %v753_v36  ;;  %v707_v48 = vadd.f32 %v706_v44, %v705_v40 }
 0x57f   :  { %940 = vpush %v707_v48  ;;  %v756_v49 = vrot.slane %v755_v46, 1  ;;  %v768_v51 = vrot.slane %v767_v45, 1 }
 0x581   :  { %v757_v52 = vadd.f32 %v756_v49, %v755_v46  ;;  %v769_v53 = vadd.f32 %v768_v51, %v767_v45 }
 0x583   :  { %942 = vpush %v757_v52 }
 0x584   :  { %944 = vpush %v769_v53 }
 0x5ac   :  { %s937_s11 = spop %936 }
 0x5ad   :  { %s602_s12 = ssub.f32 0.0, %s937_s11  ;;  %s939_s14 = spop %938 }
 0x5ae   :  { %s664_s1 = smul.f32 0.33333334, %s939_s14 }
 0x5af   :  { %s795_s13 = smul.f32 0.125, %s602_s12 }
 0x5b0   :  { %s941_s15 = spop %940 }
 0x5b1   :  { %814 = sst [smem:[#allocation3 + $0x1]] %s795_s13  ;;  %s709_s18 = smul.f32 0.33333334, %s941_s15 }
 0x5b4   :  { %s943_s16 = spop %942 }
 0x5b5   :  { %s945_s5 = spop %944 }
 0x5b6   :  { %s797_s17 = sadd.f32 1e-05, %s945_s5 }
 0x5b7   :  { %823 = sst [smem:[#allocation3 + $0x5]] %s945_s5 }
 0x5b8   :  { %v798_v37 = vstv %s797_s17 }
 0x5b9   :  { %1015 = vrcp.f32 %v798_v37 }
 0x5c3   :  { %v1016_v54 = vpop.eup %1015 }
 0x5c4   :  { %946 = vpush %v1016_v54 }
 0x5f5   :  { %s947_s19 = spop %946 }
 0x5f6   :  { %s802_s7 = smul.f32 %s947_s19, %s664_s1 }
 0x5f7   :  { %s804_s20 = smul.f32 %s947_s19, %s709_s18 }
 0x5f8   :  { %s806_s6 = smul.f32 %s947_s19, %s943_s16  ;;  %816 = sst [smem:[#allocation3 + $0x2]] %s802_s7 }
 0x5f9   :  { %s807_s8 = sadd.f32 %s804_s20, %s802_s7 }
 0x5fa   :  { %818 = sst [smem:[#allocation3 + $0x3]] %s804_s20 }
 0x5fb   :  { %s808_s21 = sadd.f32 %s807_s8, %s806_s6 }
 0x5fc   :  { %820 = sst [smem:[#allocation3 + $0x4]] %s806_s6 }
 0x5fd   :  { %s809_s24 = smul.f32 2.0, %s808_s21 }
 0x5ff   :  { %s810_s25 = sadd.f32 %s809_s24, %s795_s13 }
 0x601   :  { %812 = sst [smem:[#allocation3]] %s810_s25 }
 0x602   :  { %1028 = shalt.err (!%p1025_p4)
}
 0x603   :  { %s1045_s27 = smov [#allocation3]  }
 0x604   :  { %837 = dma.smem_to_vmem %s1045_s27, 16, %s835_s2, [#allocation4]  }
 0x605   :  { %1029 = dma.done.wait [#allocation4], 16  }
 0x606   :  { %1030 = vsyncadd [#allocation4], 4294967280 }
 0x607   :  { %841 = sfence }
 0x608   :  { %842 = vsyncpa [#allocation4], 1 }

</bundles_post_ra>
